<compile_context>
chip_gen: v7x
topology: tpu7x:2x2x1
jax: 0.10.0
libtpu: 0.0.40
codegen_flags: <defaults>
</compile_context>

<pallas_src>
import functools

import jax
import jax.numpy as jnp
from jax.experimental import pallas as pl
from jax.experimental.pallas import tpu as pltpu


# ---------------------------------------------------------------------------
# Pallas kernel: fused GRU cell + actor head (log-softmax) + critic head.
# ---------------------------------------------------------------------------
def actor_critic_kernel(x_ref, h0_ref, wx_ref, wh_ref, w1_ref, w2_ref, b_ref,
                        out_ref, *, H, A, out_pad):
    f32 = jnp.float32
    dot = lambda a, b: jnp.dot(a, b, preferred_element_type=f32)

    x = x_ref[...]                       # (bb, S)
    h0 = h0_ref[...]                     # (bb, H)
    b = b_ref[...]                       # (4, 3H) bias slab
    b_i = b[0:1, :]                      # (1, 3H)  GRU input biases  [bir|biz|bin]
    b_h = b[1:2, :]                      # (1, 3H)  GRU hidden biases [bhr|bhz|bhn]
    b_1 = b[2:3, :2 * H]                 # (1, 2H)  head-1 biases     [ba1|bv1]
    b_2 = b[3:4, :A + 1]                 # (1, A+1) head-2 biases     [ba2|bv2]

    # --- GRU cell, PyTorch gate order (r, z, n); 6 matmuls fused into 2 ---
    xg = dot(x, wx_ref[...]) + b_i       # (bb, 3H)
    hg = dot(h0, wh_ref[...]) + b_h      # (bb, 3H)
    r = jax.nn.sigmoid(xg[:, 0:H] + hg[:, 0:H])
    z = jax.nn.sigmoid(xg[:, H:2 * H] + hg[:, H:2 * H])
    n = jnp.tanh(xg[:, 2 * H:3 * H] + r * hg[:, 2 * H:3 * H])
    h = (1.0 - z) * n + z * h0           # (bb, H)  new hidden state

    # --- actor + critic heads fused: (H,2H) matmul + block-diag (2H,A+1) ---
    t1 = jnp.tanh(dot(h, w1_ref[...]) + b_1)     # (bb, 2H) = [actor tanh | critic tanh]
    head = dot(t1, w2_ref[...]) + b_2            # (bb, A+1) = [logits | value]
    logits = head[:, :A]
    value = head[:, A:A + 1]

    # --- stable softmax + log-softmax (log-probs emitted directly) ---
    m = jnp.max(logits, axis=-1, keepdims=True)
    shifted = logits - m
    log_z = jnp.log(jnp.sum(jnp.exp(shifted), axis=-1, keepdims=True))
    logp = shifted - log_z
    probs = jnp.exp(logp)

    pieces = [probs, logp, value, h]
    if out_pad:
        pieces.append(jnp.zeros((probs.shape[0], out_pad), f32))
    out_ref[...] = jnp.concatenate(pieces, axis=-1)   # one lane-dense store


# ---------------------------------------------------------------------------
# Parameter packing: 20 tensors -> 4 weight slabs + 1 bias slab.
# ---------------------------------------------------------------------------
def pack_params(p):
    H = p["whr"].shape[0]
    A = p["wa2"].shape[1]
    assert A + 1 <= 3 * H, "bias slab assumes action_dim + 1 <= 3 * n_latent"

    w_x = jnp.concatenate([p["wir"], p["wiz"], p["win"]], axis=1)    # (S, 3H)
    w_h = jnp.concatenate([p["whr"], p["whz"], p["whn"]], axis=1)    # (H, 3H)
    w_1 = jnp.concatenate([p["wa1"], p["wv1"]], axis=1)              # (H, 2H)
    w_2 = jnp.zeros((2 * H, A + 1), jnp.float32)                     # block-diag
    w_2 = w_2.at[:H, :A].set(p["wa2"]).at[H:, A:].set(p["wv2"])

    b = jnp.zeros((4, 3 * H), jnp.float32)
    b = b.at[0, :].set(jnp.concatenate([p["bir"], p["biz"], p["bin"]], axis=1)[0])
    b = b.at[1, :].set(jnp.concatenate([p["bhr"], p["bhz"], p["bhn"]], axis=1)[0])
    b = b.at[2, :2 * H].set(jnp.concatenate([p["ba1"], p["bv1"]], axis=1)[0])
    b = b.at[3, :A].set(p["ba2"][0])
    b = b.at[3, A].set(p["bv2"][0, 0])
    return {"w_x": w_x, "w_h": w_h, "w_1": w_1, "w_2": w_2, "b": b}


def _pick_block_rows(B):
    for bb in (512, 256, 128, 64, 32, 16, 8):
        if B % bb == 0:
            return bb
    return B


@jax.jit
def actor_critic_forward(x, h0, packed):
    """Fused GRU + actor + critic.  Returns (probs, logp, value, h_new)."""
    B, S = x.shape
    H = h0.shape[1]
    A = packed["w_2"].shape[1] - 1
    W = 2 * A + 1 + H                          # probs | logp | value | h_new
    OUT_W = ((W + 127) // 128) * 128           # lane-dense packed output width
    bb = _pick_block_rows(B)

    kernel = functools.partial(actor_critic_kernel, H=H, A=A, out_pad=OUT_W - W)
    full = lambda arr: pl.BlockSpec(arr.shape, lambda i: (0, 0))  # VMEM-resident

    out = pl.pallas_call(
        kernel,
        out_shape=jax.ShapeDtypeStruct((B, OUT_W), jnp.float32),
        grid=(B // bb,),
        in_specs=[
            pl.BlockSpec((bb, S), lambda i: (i, 0)),
            pl.BlockSpec((bb, H), lambda i: (i, 0)),
            full(packed["w_x"]),
            full(packed["w_h"]),
            full(packed["w_1"]),
            full(packed["w_2"]),
            full(packed["b"]),
        ],
        out_specs=pl.BlockSpec((bb, OUT_W), lambda i: (i, 0)),
        compiler_params=pltpu.CompilerParams(dimension_semantics=("parallel",)),
    )(x, h0, packed["w_x"], packed["w_h"], packed["w_1"], packed["w_2"], packed["b"])

    probs = out[:, :A]
    logp = out[:, A:2 * A]
    value = out[:, 2 * A]                      # (B,)
    h_new = out[:, 2 * A + 1:2 * A + 1 + H]
    return probs, logp, value, h_new


def evaluate(x, h0, action, packed):
    """Mirror of ActorCritic.evaluate: (logprob, value, entropy) + extras."""
    probs, logp, value, h_new = actor_critic_forward(x, h0, packed)
    action_logprobs = jnp.take_along_axis(logp, action[:, None], axis=-1)[:, 0]
    entropy = -jnp.sum(probs * logp, axis=-1)
    return action_logprobs, value, entropy, probs, h_new
    # TODO(synk): act()'s Categorical .sample(), the data-dependent prob masking
    # (state[-3] < 0.5) and Python-side `memory` appends are host-side control
    # flow with no Pallas equivalent; the unused `type_dim`/`type_ob` arguments
    # are likewise omitted.


# ---------------------------------------------------------------------------
# Deterministic parameter init (PyTorch-style uniform(-1/sqrt(fan), 1/sqrt(fan))).
# ---------------------------------------------------------------------------
def init_params(key, state_dim, n_latent, action_dim):
    def uni(k, shape, fan):
        bound = 1.0 / jnp.sqrt(jnp.asarray(fan, jnp.float32))
        return jax.random.uniform(k, shape, jnp.float32, -bound, bound)

    keys = jax.random.split(key, 21)
    p = {}
    # GRU weights: PyTorch stores (3H, in)/(3H, H); we keep each gate
    # pre-transposed to (in, H)/(H, H) so in-kernel matmuls are plain x @ W.
    p["wir"] = uni(keys[0], (state_dim, n_latent), n_latent)
    p["wiz"] = uni(keys[1], (state_dim, n_latent), n_latent)
    p["win"] = uni(keys[2], (state_dim, n_latent), n_latent)
    p["whr"] = uni(keys[3], (n_latent, n_latent), n_latent)
    p["whz"] = uni(keys[4], (n_latent, n_latent), n_latent)
    p["whn"] = uni(keys[5], (n_latent, n_latent), n_latent)
    for i, name in enumerate(("bir", "biz", "bin", "bhr", "bhz", "bhn")):
        p[name] = uni(keys[6 + i], (1, n_latent), n_latent)
    # actor head
    p["wa1"] = uni(keys[12], (n_latent, n_latent), n_latent)
    p["ba1"] = uni(keys[13], (1, n_latent), n_latent)
    p["wa2"] = uni(keys[14], (n_latent, action_dim), n_latent)
    p["ba2"] = uni(keys[15], (1, action_dim), n_latent)
    # critic head
    p["wv1"] = uni(keys[16], (n_latent, n_latent), n_latent)
    p["bv1"] = uni(keys[17], (1, n_latent), n_latent)
    p["wv2"] = uni(keys[18], (n_latent, 1), n_latent)
    p["bv2"] = uni(keys[19], (1, 1), n_latent)
    return p, keys[20]


# ---------------------------------------------------------------------------
# Pure-JAX reference (unfused math on raw params) for a correctness check.
# ---------------------------------------------------------------------------
def reference_forward(x, h0, p):
    r = jax.nn.sigmoid(x @ p["wir"] + p["bir"] + h0 @ p["whr"] + p["bhr"])
    z = jax.nn.sigmoid(x @ p["wiz"] + p["biz"] + h0 @ p["whz"] + p["bhz"])
    n = jnp.tanh(x @ p["win"] + p["bin"] + r * (h0 @ p["whn"] + p["bhn"]))
    h = (1.0 - z) * n + z * h0
    a1 = jnp.tanh(h @ p["wa1"] + p["ba1"])
    probs = jax.nn.softmax(a1 @ p["wa2"] + p["ba2"], axis=-1)
    v1 = jnp.tanh(h @ p["wv1"] + p["bv1"])
    value = v1 @ p["wv2"] + p["bv2"]
    return probs, value, h


if __name__ == "__main__":
    # Small shapes consistent with the module: state_dim=8, n_latent_var=32,
    # action_dim=6; batch B=8 (the sequence evaluate() feeds as the GRU batch).
    B, STATE_DIM, N_LATENT, ACTION_DIM = 8, 8, 32, 6

    key = jax.random.PRNGKey(0)
    params, key = init_params(key, STATE_DIM, N_LATENT, ACTION_DIM)
    packed = pack_params(params)
    kx, kh, ka = jax.random.split(key, 3)

    state = jax.random.normal(kx, (B, STATE_DIM), jnp.float32)
    rnn_history = jax.random.normal(kh, (B, N_LATENT), jnp.float32)
    action = jax.random.randint(ka, (B,), 0, ACTION_DIM)

    logp_a, value, entropy, probs, h_new = evaluate(state, rnn_history, action, packed)
    jax.block_until_ready((logp_a, value, entropy, probs, h_new))

    # correctness vs pure-JAX reference (compare matching shapes — the previous
    # failure was a (B,) vs (B,1) broadcast inside jnp.allclose, not numerics).
    probs_ref, value_ref, h_ref = reference_forward(state, rnn_history, params)
    value_ref = value_ref[:, 0]
    logp_ref = jnp.log(probs_ref)
    logp_a_ref = jnp.take_along_axis(logp_ref, action[:, None], axis=-1)[:, 0]
    entropy_ref = -jnp.sum(probs_ref * logp_ref, axis=-1)

    assert probs.shape == probs_ref.shape
    assert value.shape == value_ref.shape
    assert h_new.shape == h_ref.shape

    tol = dict(atol=1e-4, rtol=1e-4)
    assert jnp.allclose(probs, probs_ref, **tol)
    assert jnp.allclose(value, value_ref, **tol)
    assert jnp.allclose(h_new, h_ref, **tol)
    assert jnp.allclose(logp_a, logp_a_ref, **tol)
    assert jnp.allclose(entropy, entropy_ref, **tol)
    assert jnp.allclose(jnp.sum(probs, axis=-1), 1.0, atol=1e-5)

    print("KERNEL_OK")
</pallas_src>

<mosaic_0001>
module attributes {stable_mosaic.version = 11 : i64} {
  func.func @actor_critic_kernel(%arg0: i32, %arg1: memref<8x8xf32, #tpu.memory_space<vmem>>, %arg2: memref<8x32xf32, #tpu.memory_space<vmem>>, %arg3: memref<8x96xf32, #tpu.memory_space<vmem>>, %arg4: memref<32x96xf32, #tpu.memory_space<vmem>>, %arg5: memref<32x64xf32, #tpu.memory_space<vmem>>, %arg6: memref<64x7xf32, #tpu.memory_space<vmem>>, %arg7: memref<4x96xf32, #tpu.memory_space<vmem>>, %arg8: memref<8x128xf32, #tpu.memory_space<vmem>>) attributes {dimension_semantics = [#tpu.dimension_semantics<parallel>], iteration_bounds = array<i64: 1>, scalar_prefetch = 0 : i64, scratch_operands = 0 : i64, tpu.core_type = #tpu.core_type<tc>, window_params = [{transform_indices = @transform_0, window_bounds = array<i64: 8, 8>}, {transform_indices = @transform_1, window_bounds = array<i64: 8, 32>}, {pipeline_mode = #tpu.pipeline_mode<synchronous>, transform_indices = @transform_2, window_bounds = array<i64: 8, 96>}, {pipeline_mode = #tpu.pipeline_mode<synchronous>, transform_indices = @transform_3, window_bounds = array<i64: 32, 96>}, {pipeline_mode = #tpu.pipeline_mode<synchronous>, transform_indices = @transform_4, window_bounds = array<i64: 32, 64>}, {pipeline_mode = #tpu.pipeline_mode<synchronous>, transform_indices = @transform_5, window_bounds = array<i64: 64, 7>}, {pipeline_mode = #tpu.pipeline_mode<synchronous>, transform_indices = @transform_6, window_bounds = array<i64: 4, 96>}, {transform_indices = @transform_7, window_bounds = array<i64: 8, 128>}]} {
    %c0 = arith.constant 0 : index
    %c0_0 = arith.constant 0 : index
    %0 = vector.load %arg1[%c0, %c0_0] : memref<8x8xf32, #tpu.memory_space<vmem>>, vector<8x8xf32>
    %c0_1 = arith.constant 0 : index
    %c0_2 = arith.constant 0 : index
    %1 = vector.load %arg2[%c0_1, %c0_2] : memref<8x32xf32, #tpu.memory_space<vmem>>, vector<8x32xf32>
    %c0_3 = arith.constant 0 : index
    %c0_4 = arith.constant 0 : index
    %2 = vector.load %arg7[%c0_3, %c0_4] : memref<4x96xf32, #tpu.memory_space<vmem>>, vector<4x96xf32>
    %3 = vector.extract_strided_slice %2 {offsets = [0, 0], sizes = [1, 96], strides = [1, 1]} : vector<4x96xf32> to vector<1x96xf32>
    %4 = vector.extract_strided_slice %2 {offsets = [1, 0], sizes = [1, 96], strides = [1, 1]} : vector<4x96xf32> to vector<1x96xf32>
    %5 = vector.extract_strided_slice %2 {offsets = [2, 0], sizes = [1, 64], strides = [1, 1]} : vector<4x96xf32> to vector<1x64xf32>
    %6 = vector.extract_strided_slice %2 {offsets = [3, 0], sizes = [1, 7], strides = [1, 1]} : vector<4x96xf32> to vector<1x7xf32>
    %c0_5 = arith.constant 0 : index
    %c0_6 = arith.constant 0 : index
    %7 = vector.load %arg3[%c0_5, %c0_6] : memref<8x96xf32, #tpu.memory_space<vmem>>, vector<8x96xf32>
    %cst = arith.constant dense<0.000000e+00> : vector<8x96xf32>
    %8 = tpu.matmul %0, %7, %cst {dimension_numbers = #tpu.dot_dimension_numbers<[1], [0], [0], [1], [0, 0, 1, 1], [], []>} : vector<8x8xf32>, vector<8x96xf32>, vector<8x96xf32> -> vector<8x96xf32>
    %9 = vector.broadcast %3 : vector<1x96xf32> to vector<8x96xf32>
    %10 = arith.addf %8, %9 : vector<8x96xf32>
    %c0_7 = arith.constant 0 : index
    %c0_8 = arith.constant 0 : index
    %11 = vector.load %arg4[%c0_7, %c0_8] : memref<32x96xf32, #tpu.memory_space<vmem>>, vector<32x96xf32>
    %cst_9 = arith.constant dense<0.000000e+00> : vector<8x96xf32>
    %12 = tpu.matmul %1, %11, %cst_9 {dimension_numbers = #tpu.dot_dimension_numbers<[1], [0], [0], [1], [0, 0, 1, 1], [], []>} : vector<8x32xf32>, vector<32x96xf32>, vector<8x96xf32> -> vector<8x96xf32>
    %13 = vector.broadcast %4 : vector<1x96xf32> to vector<8x96xf32>
    %14 = arith.addf %12, %13 : vector<8x96xf32>
    %15 = vector.extract_strided_slice %10 {offsets = [0, 0], sizes = [8, 32], strides = [1, 1]} : vector<8x96xf32> to vector<8x32xf32>
    %16 = vector.extract_strided_slice %14 {offsets = [0, 0], sizes = [8, 32], strides = [1, 1]} : vector<8x96xf32> to vector<8x32xf32>
    %17 = arith.addf %15, %16 : vector<8x32xf32>
    %18 = arith.negf %17 : vector<8x32xf32>
    %19 = math.exp %18 : vector<8x32xf32>
    %cst_10 = arith.constant 1.000000e+00 : f32
    %20 = vector.broadcast %cst_10 : f32 to vector<8x32xf32>
    %21 = arith.addf %20, %19 : vector<8x32xf32>
    %22 = arith.divf %20, %21 : vector<8x32xf32>
    %23 = vector.extract_strided_slice %10 {offsets = [0, 32], sizes = [8, 32], strides = [1, 1]} : vector<8x96xf32> to vector<8x32xf32>
    %24 = vector.extract_strided_slice %14 {offsets = [0, 32], sizes = [8, 32], strides = [1, 1]} : vector<8x96xf32> to vector<8x32xf32>
    %25 = arith.addf %23, %24 : vector<8x32xf32>
    %26 = arith.negf %25 : vector<8x32xf32>
    %27 = math.exp %26 : vector<8x32xf32>
    %cst_11 = arith.constant 1.000000e+00 : f32
    %28 = vector.broadcast %cst_11 : f32 to vector<8x32xf32>
    %29 = arith.addf %28, %27 : vector<8x32xf32>
    %30 = arith.divf %28, %29 : vector<8x32xf32>
    %31 = vector.extract_strided_slice %10 {offsets = [0, 64], sizes = [8, 32], strides = [1, 1]} : vector<8x96xf32> to vector<8x32xf32>
    %32 = vector.extract_strided_slice %14 {offsets = [0, 64], sizes = [8, 32], strides = [1, 1]} : vector<8x96xf32> to vector<8x32xf32>
    %33 = arith.mulf %22, %32 : vector<8x32xf32>
    %34 = arith.addf %31, %33 : vector<8x32xf32>
    %35 = math.tanh %34 : vector<8x32xf32>
    %cst_12 = arith.constant 1.000000e+00 : f32
    %36 = vector.broadcast %cst_12 : f32 to vector<8x32xf32>
    %37 = arith.subf %36, %30 : vector<8x32xf32>
    %38 = arith.mulf %37, %35 : vector<8x32xf32>
    %39 = arith.mulf %30, %1 : vector<8x32xf32>
    %40 = arith.addf %38, %39 : vector<8x32xf32>
    %c0_13 = arith.constant 0 : index
    %c0_14 = arith.constant 0 : index
    %41 = vector.load %arg5[%c0_13, %c0_14] : memref<32x64xf32, #tpu.memory_space<vmem>>, vector<32x64xf32>
    %cst_15 = arith.constant dense<0.000000e+00> : vector<8x64xf32>
    %42 = tpu.matmul %40, %41, %cst_15 {dimension_numbers = #tpu.dot_dimension_numbers<[1], [0], [0], [1], [0, 0, 1, 1], [], []>} : vector<8x32xf32>, vector<32x64xf32>, vector<8x64xf32> -> vector<8x64xf32>
    %43 = vector.broadcast %5 : vector<1x64xf32> to vector<8x64xf32>
    %44 = arith.addf %42, %43 : vector<8x64xf32>
    %45 = math.tanh %44 : vector<8x64xf32>
    %c0_16 = arith.constant 0 : index
    %c0_17 = arith.constant 0 : index
    %46 = vector.load %arg6[%c0_16, %c0_17] : memref<64x7xf32, #tpu.memory_space<vmem>>, vector<64x7xf32>
    %cst_18 = arith.constant dense<0.000000e+00> : vector<8x7xf32>
    %47 = tpu.matmul %45, %46, %cst_18 {dimension_numbers = #tpu.dot_dimension_numbers<[1], [0], [0], [1], [0, 0, 1, 1], [], []>} : vector<8x64xf32>, vector<64x7xf32>, vector<8x7xf32> -> vector<8x7xf32>
    %48 = vector.broadcast %6 : vector<1x7xf32> to vector<8x7xf32>
    %49 = arith.addf %47, %48 : vector<8x7xf32>
    %50 = vector.extract_strided_slice %49 {offsets = [0, 0], sizes = [8, 6], strides = [1, 1]} : vector<8x7xf32> to vector<8x6xf32>
    %51 = vector.extract_strided_slice %49 {offsets = [0, 6], sizes = [8, 1], strides = [1, 1]} : vector<8x7xf32> to vector<8x1xf32>
    %cst_19 = arith.constant dense<0xFF800000> : vector<8xf32>
    %52 = vector.multi_reduction <maximumf>, %50, %cst_19 [1] : vector<8x6xf32> to vector<8xf32>
    %53 = vector.shape_cast %52 : vector<8xf32> to vector<8x1xf32>
    %54 = vector.broadcast %53 : vector<8x1xf32> to vector<8x6xf32>
    %55 = arith.subf %50, %54 : vector<8x6xf32>
    %56 = math.exp %55 : vector<8x6xf32>
    %cst_20 = arith.constant dense<0.000000e+00> : vector<8xf32>
    %57 = vector.multi_reduction <add>, %56, %cst_20 [1] : vector<8x6xf32> to vector<8xf32>
    %58 = vector.shape_cast %57 : vector<8xf32> to vector<8x1xf32>
    %59 = math.log %58 : vector<8x1xf32>
    %60 = vector.broadcast %59 : vector<8x1xf32> to vector<8x6xf32>
    %61 = arith.subf %55, %60 : vector<8x6xf32>
    %62 = math.exp %61 : vector<8x6xf32>
    %cst_21 = arith.constant 0.000000e+00 : f32
    %63 = vector.broadcast %cst_21 : f32 to vector<8x83xf32>
    %64 = tpu.concatenate %62, %61, %51, %40, %63 in 1 : vector<8x6xf32>, vector<8x6xf32>, vector<8x1xf32>, vector<8x32xf32>, vector<8x83xf32> -> vector<8x128xf32>
    %c0_22 = arith.constant 0 : index
    %c0_23 = arith.constant 0 : index
    %65 = vector.load %arg8[%c0_22, %c0_23] : memref<8x128xf32, #tpu.memory_space<vmem>>, vector<8x128xf32>
    tpu.vector_store %arg8[%c0_22, %c0_23], %64 {strides = array<i32>} : memref<8x128xf32, #tpu.memory_space<vmem>>, vector<8x128xf32>,
    return
  }
  func.func @transform_0(%arg0: i32) -> (i32, i32) {
    %c0_i32 = arith.constant 0 : i32
    %c0_i32_0 = arith.constant 0 : i32
    return %arg0, %c0_i32 : i32, i32
  }
  func.func @transform_1(%arg0: i32) -> (i32, i32) {
    %c0_i32 = arith.constant 0 : i32
    %c0_i32_0 = arith.constant 0 : i32
    return %arg0, %c0_i32 : i32, i32
  }
  func.func @transform_2(%arg0: i32) -> (i32, i32) {
    %c0_i32 = arith.constant 0 : i32
    %c0_i32_0 = arith.constant 0 : i32
    %c0_i32_1 = arith.constant 0 : i32
    return %c0_i32, %c0_i32_0 : i32, i32
  }
  func.func @transform_3(%arg0: i32) -> (i32, i32) {
    %c0_i32 = arith.constant 0 : i32
    %c0_i32_0 = arith.constant 0 : i32
    %c0_i32_1 = arith.constant 0 : i32
    return %c0_i32, %c0_i32_0 : i32, i32
  }
  func.func @transform_4(%arg0: i32) -> (i32, i32) {
    %c0_i32 = arith.constant 0 : i32
    %c0_i32_0 = arith.constant 0 : i32
    %c0_i32_1 = arith.constant 0 : i32
    return %c0_i32, %c0_i32_0 : i32, i32
  }
  func.func @transform_5(%arg0: i32) -> (i32, i32) {
    %c0_i32 = arith.constant 0 : i32
    %c0_i32_0 = arith.constant 0 : i32
    %c0_i32_1 = arith.constant 0 : i32
    return %c0_i32, %c0_i32_0 : i32, i32
  }
  func.func @transform_6(%arg0: i32) -> (i32, i32) {
    %c0_i32 = arith.constant 0 : i32
    %c0_i32_0 = arith.constant 0 : i32
    %c0_i32_1 = arith.constant 0 : i32
    return %c0_i32, %c0_i32_0 : i32, i32
  }
  func.func @transform_7(%arg0: i32) -> (i32, i32) {
    %c0_i32 = arith.constant 0 : i32
    %c0_i32_0 = arith.constant 0 : i32
    return %arg0, %c0_i32 : i32, i32
  }
}

</mosaic_0001>

<bundles_post_ra>
// kernel: actor_critic_forward.1
= control target key start
LH: loop header
LB: loop body
LE: loop exit
PB: predicated region body
PF: predicated region fallthrough
CT: control target
= control target key end

     0   :  { %12 = vsyncpa [#allocation3], 0  ;;  %s781_s0 = inlined_call_operand.vmem [shape: f32[8,8], index: 0, kind: input, shape index: {}]   ;;  %s782_s1 = inlined_call_operand.hbm [shape: f32[8,32], index: 1, kind: input, shape index: {}]   ;;  %s783_s2 = inlined_call_operand.vmem [shape: f32[8,96], index: 2, kind: input, shape index: {}]   ;;  %s784_s3 = inlined_call_operand.vmem [shape: f32[32,96], index: 3, kind: input, shape index: {}]   ;;  %s785_s4 = inlined_call_operand.vmem [shape: f32[32,64], index: 4, kind: input, shape index: {}]   ;;  %s786_s5 = inlined_call_operand.vmem [shape: f32[64,7], index: 5, kind: input, shape index: {}]   ;;  %s787_s6 = inlined_call_operand.hbm [shape: f32[4,96], index: 6, kind: input, shape index: {}]   ;;  %s788_s7 = inlined_call_operand.vmem [shape: f32[8,128], index: 7, kind: output, shape index: {}]  }
   0x1   :  { %13 = vsyncpa [#allocation5], 0  ;;  %s621_s24 = smov [#allocation2]   ;;  %s622_s26 = smov [#allocation4]  }
   0x2   :  { %s22_s25 = sshll.u32 %s621_s24, 4  ;;  %s40_s27 = sshll.u32 %s622_s26, 4  ;;  %s23_s25 = int_to_ptr.vmem [resolvable:$true] %s22_s25  ;;  %s41_s27 = int_to_ptr.vmem [resolvable:$true] %s40_s27 }
   0x3   :  { %s573_s30 = scalar_lea.hbm %s782_s1, 128 }
   0x4   :  { %p574_p0 = scmp.ne.s32.totalorder %s782_s1, %s573_s30  ;;  %p577_p1 = scmp.lt.u32.totalorder %s573_s30, %s782_s1 }
   0x6   :  { %p579_p2 = pnand %p577_p1, %p574_p0 }
   0x8   :  { %582 = shalt.err (!%p579_p2)
}
   0x9   :  { %s583_s12 = scalar_lea.vmem %s23_s25, 128  ;;  %p588_p4 = scmp.lt.s32.totalorder %s23_s25, %s23_s25 }
   0xa   :  { %p584_p3 = scmp.ne.s32.totalorder %s23_s25, %s583_s12  ;;  %p589_p5 = scmp.lt.s32.totalorder %s583_s12, %s583_s12 }
   0xc   :  { %p590_p6 = por %p589_p5, %p588_p4 }
   0xe   :  { %p591_p7 = pnand %p590_p6, %p584_p3 }
  0x10   :  { %594 = shalt.err (!%p591_p7)
}
  0x11   :  { %25 = dma.hbm_to_vmem [thread:$0]  %s782_s1, 128, %s23_s25, [#allocation3]  }
  0x12   :  { %s595_s17 = scalar_lea.hbm %s787_s6, 64 }
  0x13   :  { %p596_p8 = scmp.ne.s32.totalorder %s787_s6, %s595_s17  ;;  %p599_p9 = scmp.lt.u32.totalorder %s595_s17, %s787_s6 }
  0x15   :  { %p601_p10 = pnand %p599_p9, %p596_p8 }
  0x17   :  { %604 = shalt.err (!%p601_p10)
}
  0x18   :  { %s605_s22 = scalar_lea.vmem %s41_s27, 64  ;;  %p610_p12 = scmp.lt.s32.totalorder %s41_s27, %s41_s27 }
  0x19   :  { %p606_p11 = scmp.ne.s32.totalorder %s41_s27, %s605_s22  ;;  %p611_p13 = scmp.lt.s32.totalorder %s605_s22, %s605_s22 }
  0x1b   :  { %p612_p0 = por %p611_p13, %p610_p12 }
  0x1d   :  { %p613_p1 = pnand %p612_p0, %p606_p11 }
  0x1f   :  { %616 = shalt.err (!%p613_p1)
}
  0x20   :  { %43 = dma.hbm_to_vmem [thread:$0]  %s787_s6, 64, %s41_s27, [#allocation5]  }
  0x21   :  { %617 = dma.done.wait [#allocation3], 128  }
  0x22   :  { %618 = vsyncadd [#allocation3], 4294967168 }
  0x23   :  { %619 = dma.done.wait [#allocation5], 64  }
  0x24   :  { %620 = vsyncadd [#allocation5], 4294967232  ;;  %v623_v0 = vmov 0.0   ;;  %vm624_vm0 = vmmov 0   ;;  %v625_v1 = vmov 0.0|0.0   ;;  %vm58_vm1 = vcmask 64512  }
  0x25   :  { %479 = vmatprep.subr.mxu0 %v623_v0  ;;  %481 = vmatprep.mubr.msk.f32.mxu0 %vm624_vm0, %v623_v0  ;;  %v53_v2 = vld [vmem:[%s783_s2] sm:$0xff]  ;;  %v133_v5 = vld [vmem:[%s784_s3 + $0x8] sm:$0xff]  ;;  %v134_v6 = vld [vmem:[%s784_s3 + $0x10] sm:$0xff]  ;;  %vm140_vm2 = vcmask 261120   ;;  %v54_v11 = vlaneseq  ;;  %s627_s18 = smov 96   ;;  %s628_s19 = smov 32  }
  0x26   :  { %537 = vmatprep.subr.bf16.mxu1 %v625_v1  ;;  %522 = vmatprep.mubr.msk.f32.mxu1 %vm624_vm0, %v623_v0  ;;  %v50_v3 = vld [vmem:[%s781_s0] sm:$0xff]  ;;  %v135_v7 = vld [vmem:[%s784_s3 + $0x18] sm:$0xff]  ;;  %v725_v16 = vld [vmem:[#allocation4] sm:$0xf]  ;;  %s626_s0 = smov 64   ;;  %vm339_vm3 = vcmask 523264  }
  0x27   :  { %v132_v4 = vld [vmem:[%s784_s3] sm:$0xff]  ;;  %480 = vmatpush3.msra.mxu0 %v53_v2  ;;  %v529_v9 = vpack.c.bf16 %v135_v7, %v134_v6  ;;  %v722_v12 = vshrl.u32 %v54_v11, 7  ;;  %v244_v34 = vld [vmem:[%s785_s4 + $0x8] sm:$0xff]  ;;  %v245_v35 = vld [vmem:[%s785_s4 + $0x10] sm:$0xff]  ;;  %vm413_vm4 = vcmask 48128   ;;  %s630_s10 = smov 109  }
  0x28   :  { %482 = vmatmul.mubr.msk.f32.vlgmr.msra.gmra.mrb[0].mxu0 %vm58_vm1, %v50_v3  ;;  %525 = vmatprep.subr.bf16.mxu0 %v625_v1  ;;  %v526_v8 = vpack.c.bf16 %v133_v5, %v132_v4  ;;  %v51_v10 = vld [vmem:[#allocation2] sm:$0xff]  ;;  %v246_v37 = vld [vmem:[%s785_s4 + $0x18] sm:$0xff]  ;;  %v328_v41 = vld [vmem:[%s786_s5 + $0x8] sm:$0xff]  ;;  %vm440_vm5 = vcmask 97280   ;;  %vm442_vm6 = vcmask 105472   ;;  %vm444_vm7 = vcmask 367616  }
  0x29   :  { %492 = vmatprep.mubr.msk.f32.mxu0 %vm624_vm0, %v623_v0  ;;  %v138_v15 = vsub.s32 1, %v722_v12  ;;  %v56_v21 = vsub.s32 0, %v722_v12  ;;  %v243_v33 = vld [vmem:[%s785_s4] sm:$0xff]  ;;  %v535_v38 = vpack.c.bf16 %v246_v37, %v245_v35  ;;  %v329_v50 = vld [vmem:[%s786_s5 + $0x10] sm:$0xff]  ;;  %v330_v51 = vld [vmem:[%s786_s5 + $0x18] sm:$0xff]  ;;  %v249_v59 = vsub.s32 2, %v722_v12 }
  0x2a   :  { %527 = vmatpush3.bf16.msra.mxu0 %v526_v8  ;;  %v532_v36 = vpack.c.bf16 %v244_v34, %v243_v33  ;;  %v327_v40 = vld [vmem:[%s786_s5] sm:$0xff]  ;;  %v541_v52 = vpack.c.bf16 %v330_v51, %v329_v50  ;;  %v332_v54 = vld [vmem:[%s786_s5 + $0x28] sm:$0xff]  ;;  %v333_v56 = vld [vmem:[%s786_s5 + $0x30] sm:$0xff]  ;;  %v337_v2 = vsub.s32 3, %v722_v12 }
  0x2b   :  { %528 = vmatprep.subr.bf16.mxu0 %v625_v1  ;;  %v139_v17 = vrot.slane %v725_v16, %v138_v15  ;;  %v57_v22 = vrot.slane %v725_v16, %v56_v21  ;;  %v538_v42 = vpack.c.bf16 %v328_v41, %v327_v40  ;;  %v331_v53 = vld [vmem:[%s786_s5 + $0x20] sm:$0xff]  ;;  %v334_v57 = vld [vmem:[%s786_s5 + $0x38] sm:$0xff]  ;;  %v250_v60 = vrot.slane %v725_v16, %v249_v59  ;;  %s629_s5 = smov 6  }
  0x2c   :  { %v544_v55 = vpack.c.bf16 %v332_v54, %v331_v53  ;;  %v547_v58 = vpack.c.bf16 %v334_v57, %v333_v56  ;;  %v338_v3 = vrot.slane %v725_v16, %v337_v2 }
  0x2d   :  { %539 = vmatpush3.bf16.msra.mxu1 %v538_v42 }
  0x2e   :  { %530 = vmatpush3.bf16.msra.mxu0 %v529_v9  ;;  %540 = vmatprep.subr.bf16.mxu1 %v625_v1 }
  0x2f   :  { %531 = vmatprep.subr.bf16.mxu0 %v625_v1 }
  0x31   :  { %493 = vmatmul.mubr.msk.f32.vlgmr.msra.gmra.mrb[2].mxu0 %vm140_vm2, %v51_v10  ;;  %542 = vmatpush3.bf16.msra.mxu1 %v541_v52 }
  0x32   :  { %503 = vmatprep.mubr.msk.f32.mxu0 %vm624_vm0, %v623_v0  ;;  %533 = vmatpush3.bf16.msra.mxu0 %v532_v36 }
  0x33   :  { %534 = vmatprep.subr.bf16.mxu0 %v625_v1  ;;  %543 = vmatprep.subr.bf16.mxu1 %v625_v1 }
  0x35   :  { %545 = vmatpush3.bf16.msra.mxu1 %v544_v55 }
  0x36   :  { %536 = vmatpush3.bf16.msra.mxu0 %v535_v38  ;;  %546 = vmatprep.subr.bf16.mxu1 %v625_v1 }
  0x39   :  { %548 = vmatpush3.bf16.msra.mxu1 %v547_v58 }
  0xfb   :  { %v128_v13 = vpop.f32.mrb[0].mxu0 }
  0xfc   :  { %v483_v14 = vpop.f32.mrb[1].mxu0  ;;  %v129_v23 = vadd.f32 %v128_v13, %v57_v22 }
 0x104   :  { %v210_v18 = vpop.f32.mrb[2].mxu0 }
 0x105   :  { %v211_v19 = vadd.f32 %v210_v18, %v139_v17  ;;  %v494_v20 = vpop.f32.mrb[3].mxu0 }
 0x107   :  { %222 = vrot.lane.b32.xlu0 %v211_v19, %s626_s0  ;;  %v214_v24 = vadd.f32 %v211_v19, %v129_v23 }
 0x109   :  { %v455_v25 = vmul.f32 -1.442695, %v214_v24 }
 0x10b   :  { %559 = vpow2.f32 %v455_v25 }
 0x115   :  { %v560_v26 = vpop.eup %559 }
 0x116   :  { %v218_v27 = vadd.f32 1.0, %v560_v26 }
 0x118   :  { %561 = vrcp.f32 %v218_v27 }
 0x122   :  { %v562_v28 = vpop.eup %561 }
 0x123   :  { %v232_v44 = vsub.f32 1.0, %v562_v28 }
 0x179   :  { %v223_v29 = vpop.permute.xlu0 %222 }
 0x17a   :  { %v225_v30 = vmul.f32 %v562_v28, %v223_v29 }
 0x17c   :  { %227 = vrot.lane.b32.xlu0 %v225_v30, %s626_s0 }
 0x1ee   :  { %v228_v31 = vpop.permute.xlu0 %227 }
 0x1ef   :  { %v230_v32 = vadd.f32 %v228_v31, %v129_v23 }
 0x1f1   :  { %563 = vtanh.f32 %v230_v32 }
 0x1fb   :  { %v564_v39 = vpop.eup %563 }
 0x1fc   :  { %234 = vrot.lane.b32.xlu1 %v564_v39, %s627_s18 }
 0x200   :  { %238 = vrot.lane.b32.xlu1 %v51_v10, %s628_s19 }
 0x26e   :  { %v235_v43 = vpop.permute.xlu1 %234 }
 0x26f   :  { %v237_v46 = vmul.f32 %v235_v43, %v232_v44 }
 0x272   :  { %v239_v45 = vpop.permute.xlu1 %238 }
 0x273   :  { %v241_v47 = vmul.f32 %v562_v28, %v239_v45 }
 0x275   :  { %v242_v48 = vadd.f32 %v241_v47, %v237_v46 }
 0x277   :  { %252 = vrot.lane.b32.xlu0 %v242_v48, %s627_s18 }
 0x2e9   :  { %v253_v49 = vpop.permute.xlu0 %252 }
 0x2ea   :  { %504 = vmatmul.mubr.msk.f32.vlgmr.msra.gmra.mrb[4].mxu0 %vm140_vm2, %v253_v49 }
 0x3bd   :  { %v322_v61 = vpop.f32.mrb[4].mxu0 }
 0x3be   :  { %v323_v62 = vadd.f32 %v322_v61, %v250_v60  ;;  %v505_v63 = vpop.f32.mrb[5].mxu0 }
 0x3c0   :  { %565 = vtanh.f32 %v323_v62 }
 0x3ca   :  { %v566_v0 = vpop.eup %565 }
 0x3cb   :  { %523 = vmatmul.mubr.msk.f32.vlgmr.msra.gmra.mrb[0].mxu1 %vm339_vm3, %v566_v0 }
 0x49e   :  { %v409_v4 = vpop.f32.mrb[0].mxu1 }
 0x49f   :  { %v410_v5 = vadd.f32 %v409_v4, %v338_v3  ;;  %v524_v1 = vpop.f32.mrb[1].mxu1 }
 0x4a1   :  { %v414_v6 = vsel %vm413_vm4, %v410_v5, -inf }
 0x4a2   :  { %415 = vmax.xlane.f32.xlu1 %v414_v6 }
 0x4b3   :  { %433 = vrot.lane.b32.xlu1 %v410_v5, %s629_s5 }
 0x4b7   :  { %436 = vrot.lane.b32.xlu1 %v242_v48, %s630_s10 }
 0x52f   :  { %v416_v7 = vpop.xlane.xlu1 %415 }
 0x530   :  { %v417_v8 = vsub.f32 %v410_v5, %v416_v7 }
 0x532   :  { %v418_v9 = vmul.f32 1.442695, %v417_v8 }
 0x533   :  { %v434_v17 = vpop.permute.xlu1 %433 }
 0x534   :  { %567 = vpow2.f32 %v418_v9 }
 0x537   :  { %v437_v21 = vpop.permute.xlu1 %436 }
 0x53e   :  { %v568_v10 = vpop.eup %567 }
 0x53f   :  { %v420_v11 = vsel %vm413_vm4, %v568_v10, 0.0 }
 0x540   :  { %421 = vadd.xlane.f32.xlu0 %v420_v11 }
 0x5cd   :  { %v422_v12 = vpop.xlane.xlu0 %421 }
 0x5ce   :  { %569 = vlog2.f32 %v422_v12 }
 0x5d8   :  { %v570_v13 = vpop.eup %569 }
 0x5d9   :  { %v424_v14 = vmul.f32 0.6931472, %v570_v13 }
 0x5db   :  { %v425_v15 = vsub.f32 %v417_v8, %v424_v14 }
 0x5dd   :  { %429 = vrot.lane.b32.xlu0 %v425_v15, %s629_s5  ;;  %v426_v16 = vmul.f32 1.442695, %v425_v15 }
 0x5df   :  { %571 = vpow2.f32 %v426_v16 }
 0x5e9   :  { %v572_v18 = vpop.eup %571 }
 0x64f   :  { %v430_v19 = vpop.permute.xlu0 %429 }
 0x650   :  { %v439_v20 = vsel %vm413_vm4, %v572_v18, %v430_v19 }
 0x651   :  { %v441_v22 = vsel %vm440_vm5, %v439_v20, %v434_v17 }
 0x652   :  { %v443_v23 = vsel %vm442_vm6, %v441_v22, %v437_v21 }
 0x653   :  { %v445_v24 = vsel %vm444_vm7, %v443_v23, 0.0 }
 0x654   :  { %446 = vst [vmem:[%s788_s7] sm:$0xff] %v445_v24 }
 0x655   :  { %451 = vsyncpa [#allocation3], 1 }
 0x656   :  { %452 = vsyncpa [#allocation5], 1 }

</bundles_post_ra>
